<compile_context>
chip_gen: v6e
topology: v6e:2x2x1
jax: 0.10.0
libtpu: 0.0.40
codegen_flags: <defaults>
</compile_context>

<pallas_src>
import functools
import math

import jax
import jax.numpy as jnp
from jax.experimental import pallas as pl
from jax.experimental.pallas import tpu as pltpu


def _round_up(x, m):
    return ((x + m - 1) // m) * m


# ----------------------------------------------------------------------------
# Fused whole-MLP kernel: chain of (dot + bias + ReLU), final (dot + bias + tanh)*act_limit
# ----------------------------------------------------------------------------
def _make_mlp_kernel(n_layers, act_limit):
    def kernel(*refs):
        x_ref = refs[0]
        w_refs = refs[1 : 1 + n_layers]
        b_refs = refs[1 + n_layers : 1 + 2 * n_layers]
        o_ref = refs[1 + 2 * n_layers]

        h = x_ref[...]
        for i in range(n_layers):                       # static Python loop (unrolled)
            y = jnp.dot(h, w_refs[i][...], preferred_element_type=jnp.float32)
            y = y + b_refs[i][...]                      # (1, P) bias broadcasts over rows
            if i < n_layers - 1:
                h = jnp.maximum(y, 0.0)                 # hidden activation = ReLU
            else:
                h = act_limit * jnp.tanh(y)             # output activation = Tanh * act_limit
        o_ref[...] = h.astype(o_ref.dtype)

    return kernel


def mlp_actor_forward(params, obs, act_limit, *, tm=128):
    """act_limit * tanh(MLP(obs)) — entire MLP in a single Pallas kernel."""
    ws = [p["w"].astype(jnp.float32) for p in params]
    bs = [p["b"].astype(jnp.float32) for p in params]
    n_layers = len(ws)

    M, d_in = obs.shape
    dims = [d_in] + [w.shape[1] for w in ws]

    # Pad feature dims to lane width (128); pad batch only to sublane minimum (8).
    pdims = [_round_up(d, 128) for d in dims]
    Mp = _round_up(M, 8)
    tm = min(tm, Mp)
    Mp = _round_up(Mp, tm)                              # row tile divides padded batch

    x_p = jnp.pad(obs.astype(jnp.float32), ((0, Mp - M), (0, pdims[0] - d_in)))
    w_p = [
        jnp.pad(w, ((0, pdims[i] - w.shape[0]), (0, pdims[i + 1] - w.shape[1])))
        for i, w in enumerate(ws)
    ]
    b_p = [
        jnp.pad(b, (0, pdims[i + 1] - b.shape[0])).reshape(1, pdims[i + 1])
        for i, b in enumerate(bs)
    ]

    in_specs = [pl.BlockSpec((tm, pdims[0]), lambda i: (i, 0))]
    in_specs += [
        pl.BlockSpec((pdims[i], pdims[i + 1]), lambda i: (0, 0)) for i in range(n_layers)
    ]
    in_specs += [
        pl.BlockSpec((1, pdims[i + 1]), lambda i: (0, 0)) for i in range(n_layers)
    ]
    out_spec = pl.BlockSpec((tm, pdims[-1]), lambda i: (i, 0))

    wdot = sum(pdims[i] * pdims[i + 1] for i in range(n_layers))
    cost = pl.CostEstimate(
        flops=2 * Mp * wdot,
        transcendentals=Mp * pdims[-1],
        bytes_accessed=4 * (Mp * pdims[0] + wdot + sum(pdims[1:]) + Mp * pdims[-1]),
    )

    out = pl.pallas_call(
        _make_mlp_kernel(n_layers, act_limit),
        out_shape=jax.ShapeDtypeStruct((Mp, pdims[-1]), jnp.float32),
        grid_spec=pltpu.PrefetchScalarGridSpec(
            num_scalar_prefetch=0,
            grid=(Mp // tm,),
            in_specs=in_specs,
            out_specs=out_spec,
        ),
        compiler_params=pltpu.CompilerParams(dimension_semantics=("parallel",)),
        cost_estimate=cost,
    )(x_p, *w_p, *b_p)

    return out[:M, : dims[-1]]


# ----------------------------------------------------------------------------
# Parameter init (PyTorch nn.Linear-style uniform fan-in init)
# ----------------------------------------------------------------------------
def init_params(key, obs_dim, act_dim, hidden_sizes):
    sizes = [obs_dim] + list(hidden_sizes) + [act_dim]
    params = []
    for i in range(len(sizes) - 1):
        key, k1, k2 = jax.random.split(key, 3)
        bound = 1.0 / math.sqrt(sizes[i])
        params.append(
            {
                "w": jax.random.uniform(k1, (sizes[i], sizes[i + 1]), jnp.float32, -bound, bound),
                "b": jax.random.uniform(k2, (sizes[i + 1],), jnp.float32, -bound, bound),
            }
        )
    return params


if __name__ == "__main__":
    obs_dim = 16
    act_dim = 4
    hidden_sizes = [32, 32]
    act_limit = 2.0
    batch = 2

    key = jax.random.PRNGKey(0)
    key, pkey, xkey = jax.random.split(key, 3)
    params = init_params(pkey, obs_dim, act_dim, hidden_sizes)
    obs = jax.random.normal(xkey, (batch, obs_dim), jnp.float32)

    fwd = jax.jit(functools.partial(mlp_actor_forward, act_limit=act_limit))
    out = jax.block_until_ready(fwd(params, obs))

    # Pure-JAX reference (high-precision matmuls) for a sanity check.
    ref = obs
    for i, p in enumerate(params):
        ref = jnp.dot(ref, p["w"], precision=jax.lax.Precision.HIGHEST) + p["b"]
        ref = jnp.maximum(ref, 0.0) if i < len(params) - 1 else act_limit * jnp.tanh(ref)

    assert out.shape == (batch, act_dim)
    assert bool(jnp.all(jnp.abs(out) <= act_limit + 1e-5))
    assert bool(jnp.allclose(out, ref, atol=2e-2, rtol=2e-2))
    print("KERNEL_OK")
</pallas_src>

<mosaic_0001>
module attributes {stable_mosaic.version = 11 : i64} {
  func.func @kernel(%arg0: i32, %arg1: memref<8x128xf32, #tpu.memory_space<vmem>>, %arg2: memref<128x128xf32, #tpu.memory_space<vmem>>, %arg3: memref<128x128xf32, #tpu.memory_space<vmem>>, %arg4: memref<128x128xf32, #tpu.memory_space<vmem>>, %arg5: memref<1x128xf32, #tpu.memory_space<vmem>>, %arg6: memref<1x128xf32, #tpu.memory_space<vmem>>, %arg7: memref<1x128xf32, #tpu.memory_space<vmem>>, %arg8: memref<8x128xf32, #tpu.memory_space<vmem>>) attributes {dimension_semantics = [#tpu.dimension_semantics<parallel>], iteration_bounds = array<i64: 1>, scalar_prefetch = 0 : i64, scratch_operands = 0 : i64, tpu.core_type = #tpu.core_type<tc>, window_params = [{transform_indices = @transform_0, window_bounds = array<i64: 8, 128>}, {pipeline_mode = #tpu.pipeline_mode<synchronous>, transform_indices = @transform_1, window_bounds = array<i64: 128, 128>}, {pipeline_mode = #tpu.pipeline_mode<synchronous>, transform_indices = @transform_2, window_bounds = array<i64: 128, 128>}, {pipeline_mode = #tpu.pipeline_mode<synchronous>, transform_indices = @transform_3, window_bounds = array<i64: 128, 128>}, {pipeline_mode = #tpu.pipeline_mode<synchronous>, transform_indices = @transform_4, window_bounds = array<i64: 1, 128>}, {pipeline_mode = #tpu.pipeline_mode<synchronous>, transform_indices = @transform_5, window_bounds = array<i64: 1, 128>}, {pipeline_mode = #tpu.pipeline_mode<synchronous>, transform_indices = @transform_6, window_bounds = array<i64: 1, 128>}, {transform_indices = @transform_7, window_bounds = array<i64: 8, 128>}]} {
    %c0 = arith.constant 0 : index
    %c0_0 = arith.constant 0 : index
    %0 = vector.load %arg1[%c0, %c0_0] : memref<8x128xf32, #tpu.memory_space<vmem>>, vector<8x128xf32>
    %c0_1 = arith.constant 0 : index
    %c0_2 = arith.constant 0 : index
    %1 = vector.load %arg2[%c0_1, %c0_2] : memref<128x128xf32, #tpu.memory_space<vmem>>, vector<128x128xf32>
    %cst = arith.constant dense<0.000000e+00> : vector<8x128xf32>
    %2 = tpu.matmul %0, %1, %cst {dimension_numbers = #tpu.dot_dimension_numbers<[1], [0], [0], [1], [0, 0, 1, 1], [], []>} : vector<8x128xf32>, vector<128x128xf32>, vector<8x128xf32> -> vector<8x128xf32>
    %c0_3 = arith.constant 0 : index
    %c0_4 = arith.constant 0 : index
    %3 = vector.load %arg5[%c0_3, %c0_4] : memref<1x128xf32, #tpu.memory_space<vmem>>, vector<1x128xf32>
    %4 = vector.broadcast %3 : vector<1x128xf32> to vector<8x128xf32>
    %5 = arith.addf %2, %4 : vector<8x128xf32>
    %cst_5 = arith.constant 0.000000e+00 : f32
    %6 = vector.broadcast %cst_5 : f32 to vector<8x128xf32>
    %7 = arith.maximumf %5, %6 : vector<8x128xf32>
    %c0_6 = arith.constant 0 : index
    %c0_7 = arith.constant 0 : index
    %8 = vector.load %arg3[%c0_6, %c0_7] : memref<128x128xf32, #tpu.memory_space<vmem>>, vector<128x128xf32>
    %cst_8 = arith.constant dense<0.000000e+00> : vector<8x128xf32>
    %9 = tpu.matmul %7, %8, %cst_8 {dimension_numbers = #tpu.dot_dimension_numbers<[1], [0], [0], [1], [0, 0, 1, 1], [], []>} : vector<8x128xf32>, vector<128x128xf32>, vector<8x128xf32> -> vector<8x128xf32>
    %c0_9 = arith.constant 0 : index
    %c0_10 = arith.constant 0 : index
    %10 = vector.load %arg6[%c0_9, %c0_10] : memref<1x128xf32, #tpu.memory_space<vmem>>, vector<1x128xf32>
    %11 = vector.broadcast %10 : vector<1x128xf32> to vector<8x128xf32>
    %12 = arith.addf %9, %11 : vector<8x128xf32>
    %cst_11 = arith.constant 0.000000e+00 : f32
    %13 = vector.broadcast %cst_11 : f32 to vector<8x128xf32>
    %14 = arith.maximumf %12, %13 : vector<8x128xf32>
    %c0_12 = arith.constant 0 : index
    %c0_13 = arith.constant 0 : index
    %15 = vector.load %arg4[%c0_12, %c0_13] : memref<128x128xf32, #tpu.memory_space<vmem>>, vector<128x128xf32>
    %cst_14 = arith.constant dense<0.000000e+00> : vector<8x128xf32>
    %16 = tpu.matmul %14, %15, %cst_14 {dimension_numbers = #tpu.dot_dimension_numbers<[1], [0], [0], [1], [0, 0, 1, 1], [], []>} : vector<8x128xf32>, vector<128x128xf32>, vector<8x128xf32> -> vector<8x128xf32>
    %c0_15 = arith.constant 0 : index
    %c0_16 = arith.constant 0 : index
    %17 = vector.load %arg7[%c0_15, %c0_16] : memref<1x128xf32, #tpu.memory_space<vmem>>, vector<1x128xf32>
    %18 = vector.broadcast %17 : vector<1x128xf32> to vector<8x128xf32>
    %19 = arith.addf %16, %18 : vector<8x128xf32>
    %20 = math.tanh %19 : vector<8x128xf32>
    %cst_17 = arith.constant 2.000000e+00 : f32
    %21 = vector.broadcast %cst_17 : f32 to vector<8x128xf32>
    %22 = arith.mulf %21, %20 : vector<8x128xf32>
    %c0_18 = arith.constant 0 : index
    %c0_19 = arith.constant 0 : index
    %23 = vector.load %arg8[%c0_18, %c0_19] : memref<8x128xf32, #tpu.memory_space<vmem>>, vector<8x128xf32>
    tpu.vector_store %arg8[%c0_18, %c0_19], %22 {strides = array<i32>} : memref<8x128xf32, #tpu.memory_space<vmem>>, vector<8x128xf32>,
    return
  }
  func.func @transform_0(%arg0: i32) -> (i32, i32) {
    %c0_i32 = arith.constant 0 : i32
    %c0_i32_0 = arith.constant 0 : i32
    return %arg0, %c0_i32 : i32, i32
  }
  func.func @transform_1(%arg0: i32) -> (i32, i32) {
    %c0_i32 = arith.constant 0 : i32
    %c0_i32_0 = arith.constant 0 : i32
    %c0_i32_1 = arith.constant 0 : i32
    return %c0_i32, %c0_i32_0 : i32, i32
  }
  func.func @transform_2(%arg0: i32) -> (i32, i32) {
    %c0_i32 = arith.constant 0 : i32
    %c0_i32_0 = arith.constant 0 : i32
    %c0_i32_1 = arith.constant 0 : i32
    return %c0_i32, %c0_i32_0 : i32, i32
  }
  func.func @transform_3(%arg0: i32) -> (i32, i32) {
    %c0_i32 = arith.constant 0 : i32
    %c0_i32_0 = arith.constant 0 : i32
    %c0_i32_1 = arith.constant 0 : i32
    return %c0_i32, %c0_i32_0 : i32, i32
  }
  func.func @transform_4(%arg0: i32) -> (i32, i32) {
    %c0_i32 = arith.constant 0 : i32
    %c0_i32_0 = arith.constant 0 : i32
    %c0_i32_1 = arith.constant 0 : i32
    return %c0_i32, %c0_i32_0 : i32, i32
  }
  func.func @transform_5(%arg0: i32) -> (i32, i32) {
    %c0_i32 = arith.constant 0 : i32
    %c0_i32_0 = arith.constant 0 : i32
    %c0_i32_1 = arith.constant 0 : i32
    return %c0_i32, %c0_i32_0 : i32, i32
  }
  func.func @transform_6(%arg0: i32) -> (i32, i32) {
    %c0_i32 = arith.constant 0 : i32
    %c0_i32_0 = arith.constant 0 : i32
    %c0_i32_1 = arith.constant 0 : i32
    return %c0_i32, %c0_i32_0 : i32, i32
  }
  func.func @transform_7(%arg0: i32) -> (i32, i32) {
    %c0_i32 = arith.constant 0 : i32
    %c0_i32_0 = arith.constant 0 : i32
    return %arg0, %c0_i32 : i32, i32
  }
}

</mosaic_0001>

<bundles_post_ra>
// kernel: mlp_actor_forward.1
= control target key start
LH: loop header
LB: loop body
LE: loop exit
PB: predicated region body
PF: predicated region fallthrough
CT: control target
= control target key end

     0   :  { %v478_v0 = vmov 0.0   ;;  %vm479_vm0 = vmmov 0   ;;  %s733_s1 = inlined_call_operand.vmem [shape: f32[128,128], index: 1, kind: input, shape index: {}]   ;;  %s734_s2 = inlined_call_operand.vmem [shape: f32[128,128], index: 2, kind: input, shape index: {}]   ;;  %s735_s0 = inlined_call_operand.vmem [shape: f32[8,128], index: 0, kind: input, shape index: {}]   ;;  %s736_s3 = inlined_call_operand.vmem [shape: f32[128,128], index: 3, kind: input, shape index: {}]   ;;  %s737_s4 = inlined_call_operand.vmem [shape: f32[1,128], index: 4, kind: input, shape index: {}]   ;;  %s738_s5 = inlined_call_operand.vmem [shape: f32[1,128], index: 5, kind: input, shape index: {}]   ;;  %s739_s6 = inlined_call_operand.vmem [shape: f32[1,128], index: 6, kind: input, shape index: {}]   ;;  %s740_s7 = inlined_call_operand.vmem [shape: f32[8,128], index: 7, kind: output, shape index: {}]  }
   0x1   :  { %369 = vmatprep.subr.mxu0 %v478_v0  ;;  %v42_v1 = vld [vmem:[%s733_s1 + $0x78] sm:$0xff]  ;;  %v41_v2 = vld [vmem:[%s733_s1 + $0x70] sm:$0xff]  ;;  %401 = vmatprep.mubr.msk.f32.mxu0 %vm479_vm0, %v478_v0  ;;  %v40_v3 = vld [vmem:[%s733_s1 + $0x68] sm:$0xff] }
   0x2   :  { %370 = vmatpush3.msra.mxu0 %v42_v1  ;;  %404 = vmatprep.subr.mxu1 %v478_v0  ;;  %v39_v4 = vld [vmem:[%s733_s1 + $0x60] sm:$0xff]  ;;  %v136_v5 = vld [vmem:[%s734_s2 + $0x78] sm:$0xff]  ;;  %v135_v7 = vld [vmem:[%s734_s2 + $0x70] sm:$0xff] }
   0x3   :  { %371 = vmatprep.subr.mxu0 %v478_v0  ;;  %436 = vmatprep.mubr.msk.f32.mxu1 %vm479_vm0, %v478_v0  ;;  %v38_v6 = vld [vmem:[%s733_s1 + $0x58] sm:$0xff]  ;;  %v134_v8 = vld [vmem:[%s734_s2 + $0x68] sm:$0xff]  ;;  %v37_v9 = vld [vmem:[%s733_s1 + $0x50] sm:$0xff] }
   0x4   :  { %372 = vmatpush3.msra.mxu0 %v41_v2  ;;  %405 = vmatpush3.msra.mxu1 %v136_v5  ;;  %v133_v10 = vld [vmem:[%s734_s2 + $0x60] sm:$0xff]  ;;  %v36_v11 = vld [vmem:[%s733_s1 + $0x48] sm:$0xff]  ;;  %v132_v12 = vld [vmem:[%s734_s2 + $0x58] sm:$0xff] }
   0x5   :  { %373 = vmatprep.subr.mxu0 %v478_v0  ;;  %406 = vmatprep.subr.mxu1 %v478_v0  ;;  %v35_v13 = vld [vmem:[%s733_s1 + $0x40] sm:$0xff]  ;;  %v131_v14 = vld [vmem:[%s734_s2 + $0x50] sm:$0xff]  ;;  %v34_v15 = vld [vmem:[%s733_s1 + $0x38] sm:$0xff] }
   0x6   :  { %374 = vmatpush3.msra.mxu0 %v40_v3  ;;  %407 = vmatpush3.msra.mxu1 %v135_v7  ;;  %v130_v16 = vld [vmem:[%s734_s2 + $0x48] sm:$0xff]  ;;  %v33_v17 = vld [vmem:[%s733_s1 + $0x30] sm:$0xff]  ;;  %v129_v18 = vld [vmem:[%s734_s2 + $0x40] sm:$0xff] }
   0x7   :  { %375 = vmatprep.subr.mxu0 %v478_v0  ;;  %408 = vmatprep.subr.mxu1 %v478_v0  ;;  %v32_v19 = vld [vmem:[%s733_s1 + $0x28] sm:$0xff]  ;;  %v128_v20 = vld [vmem:[%s734_s2 + $0x38] sm:$0xff]  ;;  %v31_v21 = vld [vmem:[%s733_s1 + $0x20] sm:$0xff] }
   0x8   :  { %376 = vmatpush3.msra.mxu0 %v39_v4  ;;  %409 = vmatpush3.msra.mxu1 %v134_v8  ;;  %v127_v22 = vld [vmem:[%s734_s2 + $0x30] sm:$0xff]  ;;  %v30_v23 = vld [vmem:[%s733_s1 + $0x18] sm:$0xff]  ;;  %v126_v24 = vld [vmem:[%s734_s2 + $0x28] sm:$0xff] }
   0x9   :  { %377 = vmatprep.subr.mxu0 %v478_v0  ;;  %410 = vmatprep.subr.mxu1 %v478_v0  ;;  %v29_v25 = vld [vmem:[%s733_s1 + $0x10] sm:$0xff]  ;;  %v125_v26 = vld [vmem:[%s734_s2 + $0x20] sm:$0xff]  ;;  %v28_v27 = vld [vmem:[%s733_s1 + $0x8] sm:$0xff] }
   0xa   :  { %378 = vmatpush3.msra.mxu0 %v38_v6  ;;  %411 = vmatpush3.msra.mxu1 %v133_v10  ;;  %v124_v28 = vld [vmem:[%s734_s2 + $0x18] sm:$0xff]  ;;  %v27_v29 = vld [vmem:[%s733_s1] sm:$0xff]  ;;  %v123_v31 = vld [vmem:[%s734_s2 + $0x10] sm:$0xff] }
   0xb   :  { %379 = vmatprep.subr.mxu0 %v478_v0  ;;  %412 = vmatprep.subr.mxu1 %v478_v0  ;;  %v26_v30 = vld [vmem:[%s735_s0] sm:$0xff]  ;;  %v122_v32 = vld [vmem:[%s734_s2 + $0x8] sm:$0xff]  ;;  %v230_v34 = vld [vmem:[%s736_s3 + $0x78] sm:$0xff] }
   0xc   :  { %380 = vmatpush3.msra.mxu0 %v37_v9  ;;  %413 = vmatpush3.msra.mxu1 %v132_v12  ;;  %v121_v33 = vld [vmem:[%s734_s2] sm:$0xff]  ;;  %v229_v35 = vld [vmem:[%s736_s3 + $0x70] sm:$0xff]  ;;  %v228_v36 = vld [vmem:[%s736_s3 + $0x68] sm:$0xff] }
   0xd   :  { %381 = vmatprep.subr.mxu0 %v478_v0  ;;  %414 = vmatprep.subr.mxu1 %v478_v0  ;;  %v227_v37 = vld [vmem:[%s736_s3 + $0x60] sm:$0xff]  ;;  %v226_v38 = vld [vmem:[%s736_s3 + $0x58] sm:$0xff]  ;;  %v225_v39 = vld [vmem:[%s736_s3 + $0x50] sm:$0xff] }
   0xe   :  { %382 = vmatpush3.msra.mxu0 %v36_v11  ;;  %415 = vmatpush3.msra.mxu1 %v131_v14  ;;  %v224_v40 = vld [vmem:[%s736_s3 + $0x48] sm:$0xff]  ;;  %v223_v41 = vld [vmem:[%s736_s3 + $0x40] sm:$0xff]  ;;  %v222_v42 = vld [vmem:[%s736_s3 + $0x38] sm:$0xff] }
   0xf   :  { %383 = vmatprep.subr.mxu0 %v478_v0  ;;  %416 = vmatprep.subr.mxu1 %v478_v0  ;;  %v221_v43 = vld [vmem:[%s736_s3 + $0x30] sm:$0xff]  ;;  %v220_v44 = vld [vmem:[%s736_s3 + $0x28] sm:$0xff]  ;;  %v219_v45 = vld [vmem:[%s736_s3 + $0x20] sm:$0xff] }
  0x10   :  { %384 = vmatpush3.msra.mxu0 %v35_v13  ;;  %417 = vmatpush3.msra.mxu1 %v130_v16  ;;  %v218_v46 = vld [vmem:[%s736_s3 + $0x18] sm:$0xff]  ;;  %v315_v47 = vld [vmem:[%s737_s4] ss:$0 sm:$0xff]  ;;  %v217_v52 = vld [vmem:[%s736_s3 + $0x10] sm:$0xff] }
  0x11   :  { %385 = vmatprep.subr.mxu0 %v478_v0  ;;  %418 = vmatprep.subr.mxu1 %v478_v0  ;;  %v216_v53 = vld [vmem:[%s736_s3 + $0x8] sm:$0xff]  ;;  %v215_v54 = vld [vmem:[%s736_s3] sm:$0xff] }
  0x12   :  { %386 = vmatpush3.msra.mxu0 %v34_v15  ;;  %419 = vmatpush3.msra.mxu1 %v129_v18  ;;  %v316_v55 = vld [vmem:[%s738_s5] ss:$0 sm:$0xff] }
  0x13   :  { %387 = vmatprep.subr.mxu0 %v478_v0  ;;  %420 = vmatprep.subr.mxu1 %v478_v0  ;;  %v317_v60 = vld [vmem:[%s739_s6] ss:$0 sm:$0xff] }
  0x14   :  { %388 = vmatpush3.msra.mxu0 %v33_v17  ;;  %421 = vmatpush3.msra.mxu1 %v128_v20 }
  0x15   :  { %389 = vmatprep.subr.mxu0 %v478_v0  ;;  %422 = vmatprep.subr.mxu1 %v478_v0 }
  0x16   :  { %390 = vmatpush3.msra.mxu0 %v32_v19  ;;  %423 = vmatpush3.msra.mxu1 %v127_v22 }
  0x17   :  { %391 = vmatprep.subr.mxu0 %v478_v0  ;;  %424 = vmatprep.subr.mxu1 %v478_v0 }
  0x18   :  { %392 = vmatpush3.msra.mxu0 %v31_v21  ;;  %425 = vmatpush3.msra.mxu1 %v126_v24 }
  0x19   :  { %393 = vmatprep.subr.mxu0 %v478_v0  ;;  %426 = vmatprep.subr.mxu1 %v478_v0 }
  0x1a   :  { %394 = vmatpush3.msra.mxu0 %v30_v23  ;;  %427 = vmatpush3.msra.mxu1 %v125_v26 }
  0x1b   :  { %395 = vmatprep.subr.mxu0 %v478_v0  ;;  %428 = vmatprep.subr.mxu1 %v478_v0 }
  0x1c   :  { %396 = vmatpush3.msra.mxu0 %v29_v25  ;;  %429 = vmatpush3.msra.mxu1 %v124_v28 }
  0x1d   :  { %397 = vmatprep.subr.mxu0 %v478_v0  ;;  %430 = vmatprep.subr.mxu1 %v478_v0 }
  0x1e   :  { %398 = vmatpush3.msra.mxu0 %v28_v27  ;;  %431 = vmatpush3.msra.mxu1 %v123_v31 }
  0x1f   :  { %399 = vmatprep.subr.mxu0 %v478_v0  ;;  %432 = vmatprep.subr.mxu1 %v478_v0 }
  0x20   :  { %400 = vmatpush3.msra.mxu0 %v27_v29  ;;  %433 = vmatpush3.msra.mxu1 %v122_v32 }
  0x21   :  { %402 = vmatmul.mubr.f32.vlgmr.msra.gmra.mxu0 %v26_v30  ;;  %439 = vmatprep.subr.mxu0 %v478_v0 }
  0x22   :  { %471 = vmatprep.mubr.msk.f32.mxu0 %vm479_vm0, %v478_v0  ;;  %434 = vmatprep.subr.mxu1 %v478_v0 }
  0x23   :  { %435 = vmatpush3.msra.mxu1 %v121_v33  ;;  %440 = vmatpush3.msra.mxu0 %v230_v34 }
  0x24   :  { %441 = vmatprep.subr.mxu0 %v478_v0 }
  0x25   :  { %442 = vmatpush3.msra.mxu0 %v229_v35 }
  0x26   :  { %443 = vmatprep.subr.mxu0 %v478_v0 }
  0x27   :  { %444 = vmatpush3.msra.mxu0 %v228_v36 }
  0x28   :  { %445 = vmatprep.subr.mxu0 %v478_v0 }
  0x29   :  { %446 = vmatpush3.msra.mxu0 %v227_v37 }
  0x2a   :  { %447 = vmatprep.subr.mxu0 %v478_v0 }
  0x2b   :  { %448 = vmatpush3.msra.mxu0 %v226_v38 }
  0x2c   :  { %449 = vmatprep.subr.mxu0 %v478_v0 }
  0x2d   :  { %450 = vmatpush3.msra.mxu0 %v225_v39 }
  0x2e   :  { %451 = vmatprep.subr.mxu0 %v478_v0 }
  0x2f   :  { %452 = vmatpush3.msra.mxu0 %v224_v40 }
  0x30   :  { %453 = vmatprep.subr.mxu0 %v478_v0 }
  0x31   :  { %454 = vmatpush3.msra.mxu0 %v223_v41 }
  0x32   :  { %455 = vmatprep.subr.mxu0 %v478_v0 }
  0x33   :  { %456 = vmatpush3.msra.mxu0 %v222_v42 }
  0x34   :  { %457 = vmatprep.subr.mxu0 %v478_v0 }
  0x35   :  { %458 = vmatpush3.msra.mxu0 %v221_v43 }
  0x36   :  { %459 = vmatprep.subr.mxu0 %v478_v0 }
  0x37   :  { %460 = vmatpush3.msra.mxu0 %v220_v44 }
  0x38   :  { %461 = vmatprep.subr.mxu0 %v478_v0 }
  0x39   :  { %462 = vmatpush3.msra.mxu0 %v219_v45 }
  0x3a   :  { %463 = vmatprep.subr.mxu0 %v478_v0 }
  0x3b   :  { %464 = vmatpush3.msra.mxu0 %v218_v46 }
  0x3c   :  { %465 = vmatprep.subr.mxu0 %v478_v0 }
  0x3d   :  { %466 = vmatpush3.msra.mxu0 %v217_v52 }
  0x3e   :  { %467 = vmatprep.subr.mxu0 %v478_v0 }
  0x3f   :  { %468 = vmatpush3.msra.mxu0 %v216_v53 }
  0x40   :  { %469 = vmatprep.subr.mxu0 %v478_v0 }
  0x41   :  { %470 = vmatpush3.msra.mxu0 %v215_v54 }
  0xe1   :  { %v116_v48 = vpop.f32.mrf.mxu0 }
  0xe2   :  { %v117_v49 = vadd.f32 %v315_v47, %v116_v48 }
  0xe3   :  { %v403_v50 = vpop.f32.mrf.mxu0 }
  0xe4   :  { %v120_v51 = vmax.f32 %v117_v49, 0.0 }
  0xe6   :  { %437 = vmatmul.mubr.f32.vlgmr.msra.gmra.mxu1 %v120_v51 }
 0x1a6   :  { %v210_v56 = vpop.f32.mrf.mxu1 }
 0x1a7   :  { %v211_v57 = vadd.f32 %v316_v55, %v210_v56 }
 0x1a8   :  { %v438_v58 = vpop.f32.mrf.mxu1 }
 0x1a9   :  { %v214_v59 = vmax.f32 %v211_v57, 0.0 }
 0x1ab   :  { %472 = vmatmul.mubr.f32.vlgmr.msra.gmra.mxu0 %v214_v59 }
 0x26b   :  { %v304_v61 = vpop.f32.mrf.mxu0 }
 0x26c   :  { %v305_v62 = vadd.f32 %v317_v60, %v304_v61 }
 0x26d   :  { %v473_v63 = vpop.f32.mrf.mxu0 }
 0x26e   :  { %476 = vtanh.f32 %v305_v62 }
 0x27b   :  { %v477_v0 = vpop.eup %476 }
 0x27c   :  { %v309_v1 = vmul.f32 2.0, %v477_v0 }
 0x27e   :  { %310 = vst [vmem:[%s740_s7] sm:$0xff] %v309_v1 }

</bundles_post_ra>
